<compile_context>
chip_gen: v6e
topology: v6e:2x2x1
jax: 0.10.0
libtpu: 0.0.40
codegen_flags: <defaults>
</compile_context>

<pallas_src>
import functools

import jax
import jax.numpy as jnp
from jax import lax
from jax.experimental import pallas as pl
from jax.experimental.pallas import tpu as pltpu

GAMMA = 2.0          # FocalLoss(gamma=2)
LOVASZ_WEIGHT = 1.2  # weight in CombineLoss.forward


def _log_sigmoid(x):
    # numerically stable log(sigmoid(x))
    return jnp.minimum(x, 0.0) - jnp.log(1.0 + jnp.exp(-jnp.abs(x)))


def combine_loss_kernel(logits_ref, labels_ref, out_ref, tie_ref, acc_ref, *,
                        n_classes, tile_b, rows_per_core, batch):
    N = n_classes
    TB = tile_b
    c = pl.program_id(0)   # core axis (parallel)
    b = pl.program_id(1)   # batch-tile axis (arbitrary, accumulating)

    @pl.when(b == 0)
    def _init():
        acc_ref[...] = jnp.zeros((1, N), jnp.float32)
        # tie[i, j] = 1 iff i <= j (stable-sort tie break), stored in bf16.
        ri = lax.broadcasted_iota(jnp.int32, (N, N), 0)
        ci = lax.broadcasted_iota(jnp.int32, (N, N), 1)
        tie_ref[...] = jnp.where(ri <= ci, 1.0, 0.0).astype(jnp.bfloat16)

    lg = logits_ref[...].astype(jnp.float32)   # (TB, N)
    lb = labels_ref[...].astype(jnp.float32)   # (TB, N)

    inv_b = jnp.float32(1.0 / batch)
    row0 = c * rows_per_core + b * TB          # global row of first image in block

    # ------------- Focal loss: whole block at once, weighted by validity -----
    max_val = jnp.maximum(-lg, 0.0)
    bce = lg - lg * lb + max_val + jnp.log(jnp.exp(-max_val) + jnp.exp(-lg - max_val))
    invprobs = _log_sigmoid(-lg * (2.0 * lb - 1.0))
    focal_elem = jnp.exp(invprobs * GAMMA) * bce                       # (TB, N)

    row_ids = lax.broadcasted_iota(jnp.int32, (TB, 1), 0)
    w_col = jnp.where(row0 + row_ids < batch, inv_b, jnp.float32(0.0))  # (TB, 1)
    acc = acc_ref[...] + jnp.sum(focal_elem * w_col, axis=0, keepdims=True)  # (1, N)

    # ------------- Lovasz hinge, per image (sort-free stable-rank form) ------
    signs = 2.0 * lb - 1.0
    errT = (1.0 - lg * signs).T                                         # (N, TB)
    lane_idx = lax.broadcasted_iota(jnp.int32, (N, TB), 1)              # loop-invariant
    ridx8 = lax.broadcasted_iota(jnp.int32, (8, N), 0)                  # loop-invariant

    def body(i, acc_vec):
        lg_r = logits_ref[pl.ds(i, 1), :].astype(jnp.float32)           # (1, N)
        lb_r = labels_ref[pl.ds(i, 1), :].astype(jnp.float32)           # (1, N)
        err_r = 1.0 - lg_r * (2.0 * lb_r - 1.0)                         # (1, N)
        # image i's errors along sublanes via lane one-hot (robust: no
        # dynamic minor-dim slicing). Exact: adding zeros is exact.
        err_c = jnp.sum(jnp.where(lane_idx == i, errT, jnp.float32(0.0)),
                        axis=1, keepdims=True)                          # (N, 1)

        # G[i,j] = 1 iff element i is placed before-or-at j in the stable
        # descending sort of err; built directly in bf16 (0/1 values, exact).
        tie = tie_ref[...]                                              # (N, N) bf16
        G = jnp.where(err_c > err_r, jnp.bfloat16(1.0),
                      jnp.where(err_c == err_r, tie, jnp.bfloat16(0.0)))

        # rank & C via one MXU matmul: row0 of lhs = ones, row1 = labels.
        lhs8 = jnp.where(ridx8 == 0, 1.0,
                         jnp.where(ridx8 == 1, lb_r, 0.0)).astype(jnp.bfloat16)
        rc = jnp.dot(lhs8, G, preferred_element_type=jnp.float32)       # (8, N) f32
        rank = rc[0:1, :] - 1.0                                         # 0-based rank
        C = rc[1:2, :]                                                  # cumsum of sorted labels

        gts = jnp.sum(lb_r, axis=1, keepdims=True)                      # (1, 1)

        inter_cur = gts - C
        union_cur = gts + (rank + 1.0) - C
        jacc_cur = 1.0 - inter_cur / union_cur

        C_prev = C - lb_r
        inter_prev = gts - C_prev
        union_prev = jnp.maximum(gts + rank - C_prev, 1.0)   # clamp discarded branch
        jacc_prev = 1.0 - inter_prev / union_prev

        grad = jnp.where(rank < 0.5, jacc_cur, jacc_cur - jacc_prev)    # (1, N)
        elu_p1 = jnp.where(err_r > 0.0, err_r + 1.0, jnp.exp(err_r))    # F.elu(x)+1

        # per-image weight: 1/B for valid rows, 0 for batch padding
        w_i = jnp.where(row0 + i < batch, inv_b, jnp.float32(0.0))
        return acc_vec + (w_i * jnp.float32(LOVASZ_WEIGHT)) * (elu_p1 * grad)

    acc = lax.fori_loop(0, TB, body, acc)
    acc_ref[...] = acc

    @pl.when(b == pl.num_programs(1) - 1)
    def _final():
        total = jnp.sum(acc_ref[...], keepdims=True)          # (1, 1): only cross-lane reduce
        out_ref[...] = jnp.broadcast_to(total, (1, 128))      # lane-dense final write


def _device_kind():
    try:
        return jax.devices()[0].device_kind.lower()
    except Exception:
        return ""


def _default_num_cores():
    # v5e/v6e have a single TensorCore: a "parallel" core axis is just a serial
    # loop that inflates batch padding. Use 2 only on v7x (2 TCs per chip).
    return 2 if "v7" in _device_kind() else 1


def combine_loss(logits, labels, *, tile_b=32, num_cores=None):
    B, N = logits.shape
    logits = logits.astype(jnp.float32)
    labels = labels.astype(jnp.float32)

    if num_cores is None:
        num_cores = _default_num_cores()

    # Shrink the batch tile for tiny batches (avoid padded O(N^2) work); keep
    # it a multiple of 8 for f32 sublane alignment.
    per_core = -(-B // num_cores)
    tb = max(8, min(tile_b, ((per_core + 7) // 8) * 8))

    chunk = tb * num_cores
    B_pad = ((B + chunk - 1) // chunk) * chunk
    if B_pad != B:
        pad = B_pad - B
        logits = jnp.pad(logits, ((0, pad), (0, 0)))
        labels = jnp.pad(labels, ((0, pad), (0, 0)))
    nb = B_pad // chunk                 # batch tiles per core
    rows_per_core = nb * tb

    kernel = functools.partial(combine_loss_kernel, n_classes=N, tile_b=tb,
                               rows_per_core=rows_per_core, batch=B)

    # v7x has only 64 MiB physical VMEM; v5e/v6e have 128 MiB.
    vmem_limit = (48 if "v7" in _device_kind() else 64) * 1024 * 1024

    grid_spec = pltpu.PrefetchScalarGridSpec(
        num_scalar_prefetch=0,
        grid=(num_cores, nb),
        in_specs=[
            pl.BlockSpec((tb, N), lambda c, b: (c * nb + b, 0)),
            pl.BlockSpec((tb, N), lambda c, b: (c * nb + b, 0)),
        ],
        out_specs=pl.BlockSpec((1, 128), lambda c, b: (0, c)),
        scratch_shapes=[
            pltpu.VMEM((N, N), jnp.bfloat16),   # tie-break mask (i <= j), bf16
            pltpu.VMEM((1, N), jnp.float32),    # lane-resident running loss accumulator
        ],
    )

    out = pl.pallas_call(
        kernel,
        out_shape=jax.ShapeDtypeStruct((1, num_cores * 128), jnp.float32),
        grid_spec=grid_spec,
        compiler_params=pltpu.CompilerParams(
            dimension_semantics=("parallel", "arbitrary"),
            vmem_limit_bytes=vmem_limit),
    )(logits, labels)

    partials = out.reshape(num_cores, 128)[:, 0]
    return jnp.sum(partials)


# ---------------------------- pure-JAX reference ----------------------------
def reference_combine_loss(logits, labels):
    z, t = logits, labels
    # FocalLoss
    max_val = jnp.maximum(-z, 0.0)
    loss = z - z * t + max_val + jnp.log(jnp.exp(-max_val) + jnp.exp(-z - max_val))
    invprobs = jax.nn.log_sigmoid(-z * (t * 2.0 - 1.0))
    loss = jnp.exp(invprobs * GAMMA) * loss
    focal = jnp.mean(jnp.sum(loss, axis=1))

    # Lovasz hinge, per image (sort-based reference)
    def one(lg, lb):
        signs = 2.0 * lb - 1.0
        errors = 1.0 - lg * signs
        order = jnp.argsort(-errors)
        es = errors[order]
        gt = lb[order]
        gts = gt.sum()
        inter = gts - jnp.cumsum(gt)
        union = gts + jnp.cumsum(1.0 - gt)
        jacc = 1.0 - inter / union
        grad = jnp.concatenate([jacc[:1], jacc[1:] - jacc[:-1]])
        elu_p1 = jnp.where(es > 0.0, es + 1.0, jnp.exp(es))
        return jnp.dot(elu_p1, grad)

    lov = jnp.mean(jax.vmap(one)(logits, labels))
    return LOVASZ_WEIGHT * lov + focal


if __name__ == "__main__":
    key = jax.random.PRNGKey(0)
    k1, k2 = jax.random.split(key)
    B, C = 20, 128  # multi-label problem; exercises batch padding + both grid axes
    logits = jax.random.normal(k1, (B, C), dtype=jnp.float32)
    labels = (jax.random.uniform(k2, (B, C)) < 0.3).astype(jnp.float32)

    out = jax.block_until_ready(combine_loss(logits, labels))

    ref = reference_combine_loss(logits, labels)
    assert jnp.allclose(out, ref, rtol=1e-3, atol=1e-3), (out, ref)
    print("KERNEL_OK")
</pallas_src>

<mosaic_0001>
module attributes {stable_mosaic.version = 11 : i64} {
  func.func @combine_loss_kernel(%arg0: i32, %arg1: i32, %arg2: memref<24x128xf32, #tpu.memory_space<vmem>>, %arg3: memref<24x128xf32, #tpu.memory_space<vmem>>, %arg4: memref<1x128xf32, #tpu.memory_space<vmem>>, %arg5: memref<128x128xbf16, #tpu.memory_space<vmem>>, %arg6: memref<1x128xf32, #tpu.memory_space<vmem>>) attributes {dimension_semantics = [#tpu.dimension_semantics<parallel>, #tpu.dimension_semantics<arbitrary>], iteration_bounds = array<i64: 1, 1>, scalar_prefetch = 0 : i64, scratch_operands = 2 : i64, tpu.core_type = #tpu.core_type<tc>, window_params = [{transform_indices = @transform_0, window_bounds = array<i64: 24, 128>}, {transform_indices = @transform_1, window_bounds = array<i64: 24, 128>}, {transform_indices = @transform_2, window_bounds = array<i64: 1, 128>}]} {
    %c0_i32 = arith.constant 0 : i32
    %0 = arith.cmpi eq, %arg1, %c0_i32 : i32
    %1 = arith.extui %0 : i1 to i32
    %c0_i32_0 = arith.constant 0 : i32
    %2 = arith.cmpi ne, %1, %c0_i32_0 : i32
    scf.if %2 {
      %cst_31 = arith.constant 0.000000e+00 : f32
      %76 = vector.broadcast %cst_31 : f32 to vector<1x128xf32>
      %c0_32 = arith.constant 0 : index
      %c0_33 = arith.constant 0 : index
      %77 = vector.load %arg6[%c0_32, %c0_33] : memref<1x128xf32, #tpu.memory_space<vmem>>, vector<1x128xf32>
      tpu.vector_store %arg6[%c0_32, %c0_33], %76 {strides = array<i32>} : memref<1x128xf32, #tpu.memory_space<vmem>>, vector<1x128xf32>,
      %78 = tpu.iota {dimensions = array<i32: 0>} : vector<128x128xi32>
      %79 = tpu.iota {dimensions = array<i32: 1>} : vector<128x128xi32>
      %80 = arith.cmpi sle, %78, %79 : vector<128x128xi32>
      %cst_34 = arith.constant 1.000000e+00 : f32
      %cst_35 = arith.constant 0.000000e+00 : f32
      %81 = vector.broadcast %cst_34 : f32 to vector<128x128xf32>
      %82 = vector.broadcast %cst_35 : f32 to vector<128x128xf32>
      %83 = arith.select %80, %81, %82 : vector<128x128xi1>, vector<128x128xf32>
      %84 = arith.truncf %83 : vector<128x128xf32> to vector<128x128xbf16>
      %c0_36 = arith.constant 0 : index
      %c0_37 = arith.constant 0 : index
      %85 = vector.load %arg5[%c0_36, %c0_37] : memref<128x128xbf16, #tpu.memory_space<vmem>>, vector<128x128xbf16>
      tpu.vector_store %arg5[%c0_36, %c0_37], %84 {strides = array<i32>} : memref<128x128xbf16, #tpu.memory_space<vmem>>, vector<128x128xbf16>,
    } else {
    }
    %c0 = arith.constant 0 : index
    %c0_1 = arith.constant 0 : index
    %3 = vector.load %arg2[%c0, %c0_1] : memref<24x128xf32, #tpu.memory_space<vmem>>, vector<24x128xf32>
    %c0_2 = arith.constant 0 : index
    %c0_3 = arith.constant 0 : index
    %4 = vector.load %arg3[%c0_2, %c0_3] : memref<24x128xf32, #tpu.memory_space<vmem>>, vector<24x128xf32>
    %c24_i32 = arith.constant 24 : i32
    %5 = arith.muli %arg0, %c24_i32 : i32
    %c24_i32_4 = arith.constant 24 : i32
    %6 = arith.muli %arg1, %c24_i32_4 : i32
    %7 = arith.addi %5, %6 : i32
    %cst = arith.constant 0.000000e+00 : f32
    %8 = vector.broadcast %cst : f32 to vector<24x128xf32>
    %9 = arith.subf %8, %3 : vector<24x128xf32>
    %cst_5 = arith.constant 0.000000e+00 : f32
    %10 = vector.broadcast %cst_5 : f32 to vector<24x128xf32>
    %11 = arith.maximumf %9, %10 : vector<24x128xf32>
    %12 = arith.mulf %3, %4 : vector<24x128xf32>
    %13 = arith.subf %3, %12 : vector<24x128xf32>
    %14 = arith.addf %13, %11 : vector<24x128xf32>
    %cst_6 = arith.constant 0.000000e+00 : f32
    %15 = vector.broadcast %cst_6 : f32 to vector<24x128xf32>
    %16 = arith.subf %15, %11 : vector<24x128xf32>
    %17 = math.exp %16 : vector<24x128xf32>
    %cst_7 = arith.constant 0.000000e+00 : f32
    %18 = vector.broadcast %cst_7 : f32 to vector<24x128xf32>
    %19 = arith.subf %18, %3 : vector<24x128xf32>
    %20 = arith.subf %19, %11 : vector<24x128xf32>
    %21 = math.exp %20 : vector<24x128xf32>
    %22 = arith.addf %17, %21 : vector<24x128xf32>
    %23 = math.log %22 : vector<24x128xf32>
    %24 = arith.addf %14, %23 : vector<24x128xf32>
    %cst_8 = arith.constant 0.000000e+00 : f32
    %25 = vector.broadcast %cst_8 : f32 to vector<24x128xf32>
    %26 = arith.subf %25, %3 : vector<24x128xf32>
    %cst_9 = arith.constant 2.000000e+00 : f32
    %27 = vector.broadcast %cst_9 : f32 to vector<24x128xf32>
    %28 = arith.mulf %27, %4 : vector<24x128xf32>
    %cst_10 = arith.constant 1.000000e+00 : f32
    %29 = vector.broadcast %cst_10 : f32 to vector<24x128xf32>
    %30 = arith.subf %28, %29 : vector<24x128xf32>
    %31 = arith.mulf %26, %30 : vector<24x128xf32>
    %cst_11 = arith.constant 0.000000e+00 : f32
    %32 = vector.broadcast %cst_11 : f32 to vector<24x128xf32>
    %33 = arith.minimumf %31, %32 : vector<24x128xf32>
    %34 = math.absf %31 : vector<24x128xf32>
    %cst_12 = arith.constant 0.000000e+00 : f32
    %35 = vector.broadcast %cst_12 : f32 to vector<24x128xf32>
    %36 = arith.subf %35, %34 : vector<24x128xf32>
    %37 = math.exp %36 : vector<24x128xf32>
    %cst_13 = arith.constant 1.000000e+00 : f32
    %38 = vector.broadcast %cst_13 : f32 to vector<24x128xf32>
    %39 = arith.addf %38, %37 : vector<24x128xf32>
    %40 = math.log %39 : vector<24x128xf32>
    %41 = arith.subf %33, %40 : vector<24x128xf32>
    %cst_14 = arith.constant 2.000000e+00 : f32
    %42 = vector.broadcast %cst_14 : f32 to vector<24x128xf32>
    %43 = arith.mulf %41, %42 : vector<24x128xf32>
    %44 = math.exp %43 : vector<24x128xf32>
    %45 = arith.mulf %44, %24 : vector<24x128xf32>
    %46 = tpu.iota {dimensions = array<i32: 0>} : vector<24x1xi32>
    %47 = vector.broadcast %7 : i32 to vector<24x1xi32>
    %48 = arith.addi %47, %46 : vector<24x1xi32>
    %c20_i32 = arith.constant 20 : i32
    %49 = vector.broadcast %c20_i32 : i32 to vector<24x1xi32>
    %50 = arith.cmpi slt, %48, %49 : vector<24x1xi32>
    %cst_15 = arith.constant 5.000000e-02 : f32
    %cst_16 = arith.constant 0.000000e+00 : f32
    %51 = vector.broadcast %cst_15 : f32 to vector<24x1xf32>
    %52 = vector.broadcast %cst_16 : f32 to vector<24x1xf32>
    %53 = arith.select %50, %51, %52 : vector<24x1xi1>, vector<24x1xf32>
    %c0_17 = arith.constant 0 : index
    %c0_18 = arith.constant 0 : index
    %54 = vector.load %arg6[%c0_17, %c0_18] : memref<1x128xf32, #tpu.memory_space<vmem>>, vector<1x128xf32>
    %55 = vector.broadcast %53 : vector<24x1xf32> to vector<24x128xf32>
    %56 = arith.mulf %45, %55 : vector<24x128xf32>
    %cst_19 = arith.constant dense<0.000000e+00> : vector<128xf32>
    %57 = vector.multi_reduction <add>, %56, %cst_19 [0] : vector<24x128xf32> to vector<128xf32>
    %58 = vector.shape_cast %57 : vector<128xf32> to vector<1x128xf32>
    %59 = arith.addf %54, %58 : vector<1x128xf32>
    %cst_20 = arith.constant 2.000000e+00 : f32
    %60 = vector.broadcast %cst_20 : f32 to vector<24x128xf32>
    %61 = arith.mulf %60, %4 : vector<24x128xf32>
    %cst_21 = arith.constant 1.000000e+00 : f32
    %62 = vector.broadcast %cst_21 : f32 to vector<24x128xf32>
    %63 = arith.subf %61, %62 : vector<24x128xf32>
    %64 = arith.mulf %3, %63 : vector<24x128xf32>
    %cst_22 = arith.constant 1.000000e+00 : f32
    %65 = vector.broadcast %cst_22 : f32 to vector<24x128xf32>
    %66 = arith.subf %65, %64 : vector<24x128xf32>
    %67 = tpu.transpose %66, [1, 0] : vector<24x128xf32> -> vector<128x24xf32>
    %68 = tpu.iota {dimensions = array<i32: 1>} : vector<128x24xi32>
    %69 = tpu.iota {dimensions = array<i32: 0>} : vector<8x128xi32>
    %cst_23 = arith.constant 5.000000e-02 : f32
    %c0_i32_24 = arith.constant 0 : i32
    %c24_i32_25 = arith.constant 24 : i32
    %70 = arith.addi %c0_i32_24, %c24_i32_25 : i32
    %c1_i32 = arith.constant 1 : i32
    %71 = scf.for %arg7 = %c0_i32_24 to %70 step %c1_i32 iter_args(%arg8 = %59) -> (vector<1x128xf32>)  : i32 {
      %76 = arith.index_cast %arg7 : i32 to index
      %c0_31 = arith.constant 0 : index
      %77 = vector.load %arg2[%76, %c0_31] : memref<24x128xf32, #tpu.memory_space<vmem>>, vector<1x128xf32>
      %78 = arith.index_cast %arg7 : i32 to index
      %c0_32 = arith.constant 0 : index
      %79 = vector.load %arg3[%78, %c0_32] : memref<24x128xf32, #tpu.memory_space<vmem>>, vector<1x128xf32>
      %cst_33 = arith.constant 2.000000e+00 : f32
      %80 = vector.broadcast %cst_33 : f32 to vector<1x128xf32>
      %81 = arith.mulf %80, %79 : vector<1x128xf32>
      %cst_34 = arith.constant 1.000000e+00 : f32
      %82 = vector.broadcast %cst_34 : f32 to vector<1x128xf32>
      %83 = arith.subf %81, %82 : vector<1x128xf32>
      %84 = arith.mulf %77, %83 : vector<1x128xf32>
      %cst_35 = arith.constant 1.000000e+00 : f32
      %85 = vector.broadcast %cst_35 : f32 to vector<1x128xf32>
      %86 = arith.subf %85, %84 : vector<1x128xf32>
      %87 = vector.broadcast %arg7 : i32 to vector<128x24xi32>
      %88 = arith.cmpi eq, %68, %87 : vector<128x24xi32>
      %cst_36 = arith.constant 0.000000e+00 : f32
      %89 = vector.broadcast %cst_36 : f32 to vector<128x24xf32>
      %90 = arith.select %88, %67, %89 : vector<128x24xi1>, vector<128x24xf32>
      %cst_37 = arith.constant dense<0.000000e+00> : vector<128xf32>
      %91 = vector.multi_reduction <add>, %90, %cst_37 [1] : vector<128x24xf32> to vector<128xf32>
      %92 = vector.shape_cast %91 : vector<128xf32> to vector<128x1xf32>
      %c0_38 = arith.constant 0 : index
      %c0_39 = arith.constant 0 : index
      %93 = vector.load %arg5[%c0_38, %c0_39] : memref<128x128xbf16, #tpu.memory_space<vmem>>, vector<128x128xbf16>
      %94 = vector.broadcast %92 : vector<128x1xf32> to vector<128x128xf32>
      %95 = vector.broadcast %86 : vector<1x128xf32> to vector<128x128xf32>
      %96 = arith.cmpf ogt, %94, %95 : vector<128x128xf32>
      %97 = vector.broadcast %92 : vector<128x1xf32> to vector<128x128xf32>
      %98 = vector.broadcast %86 : vector<1x128xf32> to vector<128x128xf32>
      %99 = arith.cmpf oeq, %97, %98 : vector<128x128xf32>
      %cst_40 = arith.constant 0.000000e+00 : bf16
      %100 = vector.broadcast %cst_40 : bf16 to vector<128x128xbf16>
      %101 = arith.select %99, %93, %100 : vector<128x128xi1>, vector<128x128xbf16>
      %cst_41 = arith.constant 1.000000e+00 : bf16
      %102 = vector.broadcast %cst_41 : bf16 to vector<128x128xbf16>
      %103 = arith.select %96, %102, %101 : vector<128x128xi1>, vector<128x128xbf16>
      %c0_i32_42 = arith.constant 0 : i32
      %104 = vector.broadcast %c0_i32_42 : i32 to vector<8x128xi32>
      %105 = arith.cmpi eq, %69, %104 : vector<8x128xi32>
      %c1_i32_43 = arith.constant 1 : i32
      %106 = vector.broadcast %c1_i32_43 : i32 to vector<8x128xi32>
      %107 = arith.cmpi eq, %69, %106 : vector<8x128xi32>
      %cst_44 = arith.constant 0.000000e+00 : f32
      %108 = vector.shape_cast %79 : vector<1x128xf32> to vector<1x128xf32>
      %109 = vector.broadcast %108 : vector<1x128xf32> to vector<8x128xf32>
      %110 = vector.broadcast %cst_44 : f32 to vector<8x128xf32>
      %111 = arith.select %107, %109, %110 : vector<8x128xi1>, vector<8x128xf32>
      %cst_45 = arith.constant 1.000000e+00 : f32
      %112 = vector.broadcast %cst_45 : f32 to vector<8x128xf32>
      %113 = arith.select %105, %112, %111 : vector<8x128xi1>, vector<8x128xf32>
      %114 = arith.truncf %113 : vector<8x128xf32> to vector<8x128xbf16>
      %cst_46 = arith.constant dense<0.000000e+00> : vector<8x128xf32>
      %115 = tpu.matmul %114, %103, %cst_46 {dimension_numbers = #tpu.dot_dimension_numbers<[1], [0], [0], [1], [0, 0, 1, 1], [], []>} : vector<8x128xbf16>, vector<128x128xbf16>, vector<8x128xf32> -> vector<8x128xf32>
      %116 = vector.extract_strided_slice %115 {offsets = [0, 0], sizes = [1, 128], strides = [1, 1]} : vector<8x128xf32> to vector<1x128xf32>
      %cst_47 = arith.constant 1.000000e+00 : f32
      %117 = vector.broadcast %cst_47 : f32 to vector<1x128xf32>
      %118 = arith.subf %116, %117 : vector<1x128xf32>
      %119 = vector.extract_strided_slice %115 {offsets = [1, 0], sizes = [1, 128], strides = [1, 1]} : vector<8x128xf32> to vector<1x128xf32>
      %cst_48 = arith.constant dense<0.000000e+00> : vector<1xf32>
      %120 = vector.multi_reduction <add>, %79, %cst_48 [1] : vector<1x128xf32> to vector<1xf32>
      %121 = vector.shape_cast %120 : vector<1xf32> to vector<1x1xf32>
      %122 = vector.broadcast %121 : vector<1x1xf32> to vector<1x128xf32>
      %123 = arith.subf %122, %119 : vector<1x128xf32>
      %cst_49 = arith.constant 1.000000e+00 : f32
      %124 = vector.broadcast %cst_49 : f32 to vector<1x128xf32>
      %125 = arith.addf %118, %124 : vector<1x128xf32>
      %126 = vector.broadcast %121 : vector<1x1xf32> to vector<1x128xf32>
      %127 = arith.addf %126, %125 : vector<1x128xf32>
      %128 = arith.subf %127, %119 : vector<1x128xf32>
      %129 = arith.divf %123, %128 : vector<1x128xf32>
      %cst_50 = arith.constant 1.000000e+00 : f32
      %130 = vector.broadcast %cst_50 : f32 to vector<1x128xf32>
      %131 = arith.subf %130, %129 : vector<1x128xf32>
      %132 = arith.subf %119, %79 : vector<1x128xf32>
      %133 = vector.broadcast %121 : vector<1x1xf32> to vector<1x128xf32>
      %134 = arith.subf %133, %132 : vector<1x128xf32>
      %135 = vector.broadcast %121 : vector<1x1xf32> to vector<1x128xf32>
      %136 = arith.addf %135, %118 : vector<1x128xf32>
      %137 = arith.subf %136, %132 : vector<1x128xf32>
      %cst_51 = arith.constant 1.000000e+00 : f32
      %138 = vector.broadcast %cst_51 : f32 to vector<1x128xf32>
      %139 = arith.maximumf %137, %138 : vector<1x128xf32>
      %140 = arith.divf %134, %139 : vector<1x128xf32>
      %cst_52 = arith.constant 1.000000e+00 : f32
      %141 = vector.broadcast %cst_52 : f32 to vector<1x128xf32>
      %142 = arith.subf %141, %140 : vector<1x128xf32>
      %cst_53 = arith.constant 5.000000e-01 : f32
      %143 = vector.broadcast %cst_53 : f32 to vector<1x128xf32>
      %144 = arith.cmpf olt, %118, %143 : vector<1x128xf32>
      %145 = arith.subf %131, %142 : vector<1x128xf32>
      %146 = arith.select %144, %131, %145 : vector<1x128xi1>, vector<1x128xf32>
      %cst_54 = arith.constant 0.000000e+00 : f32
      %147 = vector.broadcast %cst_54 : f32 to vector<1x128xf32>
      %148 = arith.cmpf ogt, %86, %147 : vector<1x128xf32>
      %cst_55 = arith.constant 1.000000e+00 : f32
      %149 = vector.broadcast %cst_55 : f32 to vector<1x128xf32>
      %150 = arith.addf %86, %149 : vector<1x128xf32>
      %151 = math.exp %86 : vector<1x128xf32>
      %152 = arith.select %148, %150, %151 : vector<1x128xi1>, vector<1x128xf32>
      %153 = arith.addi %7, %arg7 : i32
      %c20_i32_56 = arith.constant 20 : i32
      %154 = arith.cmpi slt, %153, %c20_i32_56 : i32
      %cst_57 = arith.constant 0.000000e+00 : f32
      %155 = arith.select %154, %cst_23, %cst_57 : f32
      %cst_58 = arith.constant 1.200000e+00 : f32
      %156 = arith.mulf %155, %cst_58 : f32
      %157 = arith.mulf %152, %146 : vector<1x128xf32>
      %158 = vector.broadcast %156 : f32 to vector<1x128xf32>
      %159 = arith.mulf %158, %157 : vector<1x128xf32>
      %160 = arith.addf %arg8, %159 : vector<1x128xf32>
      scf.yield %160 : vector<1x128xf32>
    }
    %c24_i32_26 = arith.constant 24 : i32
    %c0_27 = arith.constant 0 : index
    %c0_28 = arith.constant 0 : index
    %72 = vector.load %arg6[%c0_27, %c0_28] : memref<1x128xf32, #tpu.memory_space<vmem>>, vector<1x128xf32>
    tpu.vector_store %arg6[%c0_27, %c0_28], %71 {strides = array<i32>} : memref<1x128xf32, #tpu.memory_space<vmem>>, vector<1x128xf32>,
    %c0_i32_29 = arith.constant 0 : i32
    %73 = arith.cmpi eq, %arg1, %c0_i32_29 : i32
    %74 = arith.extui %73 : i1 to i32
    %c0_i32_30 = arith.constant 0 : i32
    %75 = arith.cmpi ne, %74, %c0_i32_30 : i32
    scf.if %75 {
      %c0_31 = arith.constant 0 : index
      %c0_32 = arith.constant 0 : index
      %76 = vector.load %arg6[%c0_31, %c0_32] : memref<1x128xf32, #tpu.memory_space<vmem>>, vector<1x128xf32>
      %77 = vector.shape_cast %76 : vector<1x128xf32> to vector<1x1x128xf32>
      %cst_33 = arith.constant dense<0.000000e+00> : vector<1xf32>
      %78 = vector.multi_reduction <add>, %77, %cst_33 [1, 2] : vector<1x1x128xf32> to vector<1xf32>
      %79 = vector.shape_cast %78 : vector<1xf32> to vector<1x1x1xf32>
      %80 = vector.extract %79[0, 0, 0] : f32 from vector<1x1x1xf32>
      %81 = vector.broadcast %80 : f32 to vector<1x1xf32>
      %82 = vector.shape_cast %81 : vector<1x1xf32> to vector<1x1xf32>
      %83 = vector.broadcast %82 : vector<1x1xf32> to vector<1x128xf32>
      %c0_34 = arith.constant 0 : index
      %c0_35 = arith.constant 0 : index
      %84 = vector.load %arg4[%c0_34, %c0_35] : memref<1x128xf32, #tpu.memory_space<vmem>>, vector<1x128xf32>
      tpu.vector_store %arg4[%c0_34, %c0_35], %83 {strides = array<i32>} : memref<1x128xf32, #tpu.memory_space<vmem>>, vector<1x128xf32>,
    } else {
    }
    return
  }
  func.func @transform_0(%arg0: i32, %arg1: i32) -> (i32, i32) {
    %c1_i32 = arith.constant 1 : i32
    %0 = arith.muli %arg0, %c1_i32 : i32
    %1 = arith.addi %0, %arg1 : i32
    %c0_i32 = arith.constant 0 : i32
    %c0_i32_0 = arith.constant 0 : i32
    return %1, %c0_i32 : i32, i32
  }
  func.func @transform_1(%arg0: i32, %arg1: i32) -> (i32, i32) {
    %c1_i32 = arith.constant 1 : i32
    %0 = arith.muli %arg0, %c1_i32 : i32
    %1 = arith.addi %0, %arg1 : i32
    %c0_i32 = arith.constant 0 : i32
    %c0_i32_0 = arith.constant 0 : i32
    return %1, %c0_i32 : i32, i32
  }
  func.func @transform_2(%arg0: i32, %arg1: i32) -> (i32, i32) {
    %c0_i32 = arith.constant 0 : i32
    %c0_i32_0 = arith.constant 0 : i32
    return %c0_i32, %arg0 : i32, i32
  }
}

</mosaic_0001>

<bundles_post_ra>
// kernel: tpu_custom_call.1
= control target key start
LH: loop header
LB: loop body
LE: loop exit
PB: predicated region body
PF: predicated region fallthrough
CT: control target
= control target key end

     0   :  { %7 = vsyncpa [#allocation5], 0  ;;  %s1318_s0 = inlined_call_operand.hbm [shape: f32[24,128], index: 0, kind: input, shape index: {}]   ;;  %s1319_s1 = inlined_call_operand.hbm [shape: f32[24,128], index: 1, kind: input, shape index: {}]   ;;  %s1320_s2 = inlined_call_operand.hbm [shape: f32[1,128], index: 2, kind: output, shape index: {}]  }
   0x1   :  { %8 = vsyncpa [#allocation8], 0 }
   0x2   :  { %9 = vsyncpa [#allocation6], 0  ;;  %s998_s9 = smov [#allocation4]  }
   0x3   :  { %s19_s10 = sshll.u32 %s998_s9, 4  ;;  %s20_s10 = int_to_ptr.vmem [resolvable:$true] %s19_s10 }
   0x4   :  { %s924_s11 = scalar_lea.vmem %s20_s10, 384  ;;  %p929_p1 = scmp.lt.s32.totalorder %s20_s10, %s20_s10 }
   0x5   :  { %p925_p0 = scmp.ne.s32.totalorder %s20_s10, %s924_s11  ;;  %p930_p2 = scmp.lt.s32.totalorder %s924_s11, %s924_s11 }
   0x7   :  { %p931_p3 = por %p930_p2, %p929_p1 }
   0x9   :  { %p932_p4 = pnand %p931_p3, %p925_p0 }
   0xb   :  { %935 = shalt.err (!%p932_p4)
}
   0xc   :  { %s999_s12 = smov 128   ;;  %s1000_s13 = smov 8  }
   0xd   :  { %25 = dma.hbm_to_vmem [thread:$0]  %s1318_s0, 384, %s20_s10, [#allocation5], %s999_s12, %s999_s12, %s1000_s13  }
   0xe   :  { %s1001_s16 = smov [#allocation7]  }
   0xf   :  { %s35_s17 = sshll.u32 %s1001_s16, 4  ;;  %s36_s17 = int_to_ptr.vmem [resolvable:$true] %s35_s17 }
  0x10   :  { %s944_s18 = scalar_lea.vmem %s36_s17, 384  ;;  %p949_p6 = scmp.lt.s32.totalorder %s36_s17, %s36_s17 }
  0x11   :  { %p945_p5 = scmp.ne.s32.totalorder %s36_s17, %s944_s18  ;;  %p950_p7 = scmp.lt.s32.totalorder %s944_s18, %s944_s18 }
  0x13   :  { %p951_p8 = por %p950_p7, %p949_p6 }
  0x15   :  { %p952_p9 = pnand %p951_p8, %p945_p5 }
  0x17   :  { %955 = shalt.err (!%p952_p9)
}
  0x18   :  { %41 = dma.hbm_to_vmem [thread:$0]  %s1319_s1, 384, %s36_s17, [#allocation8], %s999_s12, %s999_s12, %s1000_s13  }
  0x19   :  { %984 = dma.done.wait [#allocation5], 384  }
  0x1a   :  { %985 = vsyncadd [#allocation5], 4294966912 }
  0x1b   :  { %986 = dma.done.wait [#allocation8], 384  }
  0x1c   :  { %987 = vsyncadd [#allocation8], 4294966912  ;;  %v59_v0 = vlaneseq  ;;  %v1002_v1 = vmov 0.0   ;;  %v193_v30 = vld [vmem:[#allocation7] sm:$0xff]  ;;  %v194_v35 = vld [vmem:[#allocation7 + $0x8] sm:$0xff]  ;;  %s1134_s0 = smov 0  }
  0x1d   :  { %58 = vst [vmem:[#allocation3] sm:$0x1] %v1002_v1  ;;  %v190_v40 = vld [vmem:[#allocation4] sm:$0xff]  ;;  %v191_v41 = vld [vmem:[#allocation4 + $0x8] sm:$0xff]  ;;  %v244_v42 = vmul.f32 2.0, %v193_v30  ;;  %v245_v47 = vmul.f32 2.0, %v194_v35 }
  0x1e   :  { %v1028_v2 = vshrl.u32 %v59_v0, 7  ;;  %v1030_v3 = vand.u32 127, %v59_v0  ;;  %v199_v43 = vsub.f32 0.0, %v190_v40  ;;  %v205_v44 = vmul.f32 %v193_v30, %v190_v40 }
  0x1f   :  { %v200_v45 = vsub.f32 0.0, %v191_v41  ;;  %v206_v46 = vmul.f32 %v194_v35, %v191_v41  ;;  %v759_v49 = vadd.f32 -1.0, %v244_v42  ;;  %v760_v54 = vadd.f32 -1.0, %v245_v47 }
  0x20   :  { %v61_v4 = vadd.s32 8, %v1028_v2  ;;  %v64_v5 = vadd.s32 32, %v1028_v2  ;;  %v65_v6 = vadd.s32 40, %v1028_v2  ;;  %v66_v7 = vadd.s32 48, %v1028_v2 }
  0x21   :  { %v67_v8 = vadd.s32 56, %v1028_v2  ;;  %v68_v9 = vadd.s32 64, %v1028_v2  ;;  %v69_v10 = vadd.s32 72, %v1028_v2  ;;  %v70_v11 = vadd.s32 80, %v1028_v2 }
  0x22   :  { %v71_v12 = vadd.s32 88, %v1028_v2  ;;  %v72_v13 = vadd.s32 96, %v1028_v2  ;;  %v73_v14 = vadd.s32 104, %v1028_v2  ;;  %v74_v15 = vadd.s32 112, %v1028_v2 }
  0x23   :  { %v75_v16 = vadd.s32 120, %v1028_v2  ;;  %vm78_vm0 = vcmp.le.s32.totalorder %v1028_v2, %v1030_v3  ;;  %vm79_vm1 = vcmp.le.s32.totalorder %v61_v4, %v1030_v3  ;;  %vm82_vm2 = vcmp.le.s32.totalorder %v64_v5, %v1030_v3 }
  0x24   :  { %vm83_vm3 = vcmp.le.s32.totalorder %v65_v6, %v1030_v3  ;;  %vm84_vm4 = vcmp.le.s32.totalorder %v66_v7, %v1030_v3  ;;  %vm85_vm5 = vcmp.le.s32.totalorder %v67_v8, %v1030_v3  ;;  %vm86_vm6 = vcmp.le.s32.totalorder %v68_v9, %v1030_v3 }
  0x25   :  { %vm87_vm7 = vcmp.le.s32.totalorder %v69_v10, %v1030_v3  ;;  %vm88_vm8 = vcmp.le.s32.totalorder %v70_v11, %v1030_v3  ;;  %vm89_vm9 = vcmp.le.s32.totalorder %v71_v12, %v1030_v3  ;;  %vm90_vm10 = vcmp.le.s32.totalorder %v72_v13, %v1030_v3 }
  0x26   :  { %vm91_vm11 = vcmp.le.s32.totalorder %v73_v14, %v1030_v3  ;;  %vm92_vm12 = vcmp.le.s32.totalorder %v74_v15, %v1030_v3  ;;  %vm93_vm13 = vcmp.le.s32.totalorder %v75_v16, %v1030_v3  ;;  %v94_v17 = vsel %vm78_vm0, 1.0, %v1002_v1  ;;  %v192_v15 = vld [vmem:[#allocation4 + $0x10] sm:$0xff]  ;;  %v195_v16 = vld [vmem:[#allocation7 + $0x10] sm:$0xff] }
  0x27   :  { %v95_v18 = vsel %vm79_vm1, 1.0, %v1002_v1  ;;  %v98_v19 = vsel %vm82_vm2, 1.0, %v1002_v1  ;;  %v99_v20 = vsel %vm83_vm3, 1.0, %v1002_v1  ;;  %v100_v21 = vsel %vm84_vm4, 1.0, %v1002_v1 }
  0x28   :  { %v101_v22 = vsel %vm85_vm5, 1.0, %v1002_v1  ;;  %v102_v23 = vsel %vm86_vm6, 1.0, %v1002_v1  ;;  %v103_v24 = vsel %vm87_vm7, 1.0, %v1002_v1  ;;  %v104_v25 = vsel %vm88_vm8, 1.0, %v1002_v1 }
  0x29   :  { %v105_v26 = vsel %vm89_vm9, 1.0, %v1002_v1  ;;  %v106_v27 = vsel %vm90_vm10, 1.0, %v1002_v1  ;;  %v107_v28 = vsel %vm91_vm11, 1.0, %v1002_v1  ;;  %v108_v29 = vsel %vm92_vm12, 1.0, %v1002_v1 }
  0x2a   :  { %v109_v31 = vsel %vm93_vm13, 1.0, %v1002_v1  ;;  %v789_v32 = vpack.c.bf16 %v95_v18, %v94_v17  ;;  %v795_v33 = vpack.c.bf16 %v99_v20, %v98_v19  ;;  %v798_v34 = vpack.c.bf16 %v101_v22, %v100_v21 }
  0x2b   :  { %v801_v36 = vpack.c.bf16 %v103_v24, %v102_v23  ;;  %v804_v37 = vpack.c.bf16 %v105_v26, %v104_v25  ;;  %v807_v38 = vpack.c.bf16 %v107_v28, %v106_v27  ;;  %v810_v39 = vpack.c.bf16 %v109_v31, %v108_v29 }
  0x2c   :  { %790 = vst [vmem:[#allocation2] sm:$0xff] %v789_v32   ;;  %813 = vst [vmem:[#allocation2 + $0x10] sm:$0xff] %v795_v33   ;;  %v62_v48 = vadd.s32 16, %v1028_v2  ;;  %v202_v50 = vmax.f32 %v199_v43, 0.0  ;;  %v208_v51 = vsub.f32 %v190_v40, %v205_v44  ;;  %v203_v52 = vmax.f32 %v200_v45, 0.0 }
  0x2d   :  { %814 = vst [vmem:[#allocation2 + $0x18] sm:$0xff] %v798_v34   ;;  %815 = vst [vmem:[#allocation2 + $0x20] sm:$0xff] %v801_v36   ;;  %v209_v53 = vsub.f32 %v191_v41, %v206_v46  ;;  %v63_v55 = vadd.s32 24, %v1028_v2  ;;  %v319_v56 = vmul.f32 %v759_v49, %v190_v40  ;;  %v1079_v60 = vmul.f32 %v759_v49, %v199_v43 }
  0x2e   :  { %816 = vst [vmem:[#allocation2 + $0x28] sm:$0xff] %v804_v37   ;;  %817 = vst [vmem:[#allocation2 + $0x30] sm:$0xff] %v807_v38   ;;  %vm80_vm14 = vcmp.le.s32.totalorder %v62_v48, %v1030_v3  ;;  %v1077_v57 = vadd.f32 %v208_v51, %v202_v50  ;;  %v214_v58 = vsub.f32 0.0, %v202_v50  ;;  %v223_v59 = vsub.f32 %v199_v43, %v202_v50 }
  0x2f   :  { %818 = vst [vmem:[#allocation2 + $0x38] sm:$0xff] %v810_v39   ;;  %v1081_v61 = vadd.f32 %v209_v53, %v203_v52  ;;  %v215_v62 = vsub.f32 0.0, %v203_v52  ;;  %v224_v63 = vsub.f32 %v200_v45, %v203_v52  ;;  %v322_v0 = vsub.f32 1.0, %v319_v56 }
  0x30   :  { %v217_v4 = vmul.f32 1.442695, %v214_v58  ;;  %v226_v5 = vmul.f32 1.442695, %v223_v59  ;;  %v1083_v6 = vmul.f32 %v760_v54, %v200_v45  ;;  %v256_v7 = vand.u32 2147483647, %v1079_v60 }
  0x31   :  { %v219_v8 = vmul.f32 1.442695, %v215_v62  ;;  %v320_v9 = vmul.f32 %v760_v54, %v191_v41  ;;  %vm81_vm15 = vcmp.le.s32.totalorder %v63_v55, %v1030_v3  ;;  %325 = vxpose.xlu0.b32.start [1/3] (short) %v322_v0, 128  ;;  %v228_v10 = vmul.f32 1.442695, %v224_v63 }
  0x32   :  { %874 = vpow2.f32 %v217_v4  ;;  %v257_v11 = vand.u32 2147483647, %v1083_v6  ;;  %v259_v12 = vsub.f32 0.0, %v256_v7  ;;  %v96_v14 = vsel %vm80_vm14, 1.0, %v1002_v1 }
  0x33   :  { %876 = vpow2.f32 %v226_v5  ;;  %v323_v13 = vsub.f32 1.0, %v320_v9  ;;  %v97_v18 = vsel %vm81_vm15, 1.0, %v1002_v1  ;;  %v201_v19 = vsub.f32 0.0, %v192_v15 }
  0x34   :  { %878 = vpow2.f32 %v219_v8  ;;  %v260_v17 = vsub.f32 0.0, %v257_v11  ;;  %v262_v20 = vmul.f32 1.442695, %v259_v12  ;;  %v792_v21 = vpack.c.bf16 %v97_v18, %v96_v14 }
  0x35   :  { %880 = vpow2.f32 %v228_v10  ;;  %v207_v22 = vmul.f32 %v195_v16, %v192_v15  ;;  %326 = vxpose.xlu0.b32.cont [2/3] (short) %v323_v13, 128  ;;  %v204_v24 = vmax.f32 %v201_v19, 0.0  ;;  %v246_v25 = vmul.f32 2.0, %v195_v16 }
  0x36   :  { %v264_v23 = vmul.f32 1.442695, %v260_v17  ;;  %vm302_vm0 = vcmp.lt.s32.totalorder %v62_v48, 20  ;;  %882 = vpow2.f32 %v262_v20  ;;  %812 = vst [vmem:[#allocation2 + $0x8] sm:$0xff] %v792_v21   ;;  %v253_v59 = vmin.f32 %v1079_v60, 0.0 }
  0x37   :  { %v210_v26 = vsub.f32 %v192_v15, %v207_v22  ;;  %v1093_v27 = vsel %vm302_vm0, 0.05, %v1002_v1  ;;  %v216_v28 = vsub.f32 0.0, %v204_v24  ;;  %v225_v29 = vsub.f32 %v201_v19, %v204_v24 }
  0x38   :  { %884 = vpow2.f32 %v264_v23  ;;  %v761_v30 = vadd.f32 -1.0, %v246_v25  ;;  %v254_v0 = vmin.f32 %v1083_v6, 0.0 }
  0x39   :  { %v213_v31 = vadd.f32 %v210_v26, %v204_v24  ;;  %v221_v32 = vmul.f32 1.442695, %v216_v28  ;;  %v230_v33 = vmul.f32 1.442695, %v225_v29 }
  0x3a   :  { %v252_v34 = vmul.f32 %v761_v30, %v201_v19  ;;  %v321_v35 = vmul.f32 %v761_v30, %v192_v15 }
  0x3b   :  { %886 = vpow2.f32 %v221_v32 }
  0x3c   :  { %v258_v36 = vand.u32 2147483647, %v252_v34  ;;  %v324_v37 = vsub.f32 1.0, %v321_v35  ;;  %888 = vpow2.f32 %v230_v33  ;;  %v255_v60 = vmin.f32 %v252_v34, 0.0 }
  0x3e   :  { %v261_v38 = vsub.f32 0.0, %v258_v36  ;;  %327 = vxpose.xlu0.b32.end [3/3] (short) %v324_v37, 128  ;;  %v306_v37 = vld [vmem:[#allocation3] sm:$0x1] }
  0x3f   :  { %v875_v39 = vpop.eup %874 }
  0x40   :  { %v877_v40 = vpop.eup %876  ;;  %v266_v1 = vmul.f32 1.442695, %v261_v38 }
  0x41   :  { %v879_v41 = vpop.eup %878  ;;  %v232_v42 = vadd.f32 %v877_v40, %v875_v39 }
  0x42   :  { %v881_v43 = vpop.eup %880  ;;  %890 = vpow2.f32 %v266_v1 }
  0x43   :  { %892 = vlog2.f32 %v232_v42  ;;  %v233_v44 = vadd.f32 %v881_v43, %v879_v41  ;;  %v883_v45 = vpop.eup %882 }
  0x44   :  { %v268_v47 = vadd.f32 1.0, %v883_v45 }
  0x45   :  { %v885_v46 = vpop.eup %884  ;;  %894 = vlog2.f32 %v233_v44 }
  0x46   :  { %v269_v48 = vadd.f32 1.0, %v885_v46  ;;  %896 = vlog2.f32 %v268_v47 }
  0x48   :  { %898 = vlog2.f32 %v269_v48  ;;  %v887_v49 = vpop.eup %886 }
  0x49   :  { %v889_v50 = vpop.eup %888 }
  0x4a   :  { %v234_v51 = vadd.f32 %v889_v50, %v887_v49 }
  0x4c   :  { %900 = vlog2.f32 %v234_v51 }
  0x4f   :  { %v891_v52 = vpop.eup %890 }
  0x50   :  { %v893_v53 = vpop.eup %892  ;;  %v270_v54 = vadd.f32 1.0, %v891_v52 }
  0x51   :  { %v236_v55 = vmul.f32 0.6931472, %v893_v53 }
  0x52   :  { %v895_v56 = vpop.eup %894  ;;  %902 = vlog2.f32 %v270_v54 }
  0x53   :  { %v241_v58 = vadd.f32 %v236_v55, %v1077_v57  ;;  %v238_v62 = vmul.f32 0.6931472, %v895_v56  ;;  %v897_v63 = vpop.eup %896 }
  0x54   :  { %v272_v5 = vmul.f32 0.6931472, %v897_v63 }
  0x55   :  { %v899_v4 = vpop.eup %898  ;;  %v242_v7 = vadd.f32 %v238_v62, %v1081_v61 }
  0x56   :  { %v274_v8 = vmul.f32 0.6931472, %v899_v4  ;;  %v277_v9 = vsub.f32 %v253_v59, %v272_v5 }
  0x58   :  { %v278_v10 = vsub.f32 %v254_v0, %v274_v8  ;;  %v280_v11 = vmul.f32 2.0, %v277_v9 }
  0x59   :  { %v901_v12 = vpop.eup %900 }
  0x5a   :  { %v281_v13 = vmul.f32 2.0, %v278_v10  ;;  %v283_v14 = vmul.f32 1.442695, %v280_v11  ;;  %v240_v15 = vmul.f32 0.6931472, %v901_v12 }
  0x5c   :  { %v285_v16 = vmul.f32 1.442695, %v281_v13  ;;  %904 = vpow2.f32 %v283_v14  ;;  %v243_v57 = vadd.f32 %v240_v15, %v213_v31 }
  0x5e   :  { %906 = vpow2.f32 %v285_v16 }
  0x5f   :  { %v903_v17 = vpop.eup %902 }
  0x60   :  { %v276_v18 = vmul.f32 0.6931472, %v903_v17 }
  0x62   :  { %v279_v6 = vsub.f32 %v255_v60, %v276_v18 }
  0x64   :  { %v282_v19 = vmul.f32 2.0, %v279_v6 }
  0x66   :  { %v287_v20 = vmul.f32 1.442695, %v282_v19 }
  0x68   :  { %908 = vpow2.f32 %v287_v20 }
  0x69   :  { %v905_v61 = vpop.eup %904 }
  0x6a   :  { %v289_v22 = vmul.f32 %v905_v61, %v241_v58 }
  0x6b   :  { %v907_v21 = vpop.eup %906 }
  0x6c   :  { %v290_v23 = vmul.f32 %v907_v21, %v242_v7  ;;  %v307_v24 = vmul.f32 0.05, %v289_v22 }
  0x6e   :  { %v308_v25 = vmul.f32 0.05, %v290_v23 }
  0x70   :  { %v310_v26 = vadd.f32 %v308_v25, %v307_v24 }
  0x75   :  { %v909_v28 = vpop.eup %908 }
  0x76   :  { %v291_v29 = vmul.f32 %v909_v28, %v243_v57 }
  0x78   :  { %v309_v30 = vmul.f32 %v1093_v27, %v291_v29 }
  0x7a   :  { %v311_v31 = vadd.f32 %v310_v26, %v309_v30 }
  0x7c   :  { %v312_v32 = vrot.slane %v311_v31, 4 }
  0x7e   :  { %v313_v33 = vadd.f32 %v312_v32, %v311_v31 }
  0x80   :  { %v314_v34 = vrot.slane %v313_v33, 2 }
  0x82   :  { %v315_v35 = vadd.f32 %v314_v34, %v313_v33 }
  0x84   :  { %v316_v36 = vrot.slane %v315_v35, 1 }
  0x86   :  { %v317_v38 = vadd.f32 %v316_v36, %v315_v35 }
  0x88   :  { %v318_v39 = vadd.f32 %v317_v38, %v306_v37  }
  0xb2   :  { %v1100_v40 = vpop.trf.xlu0 }
  0xb6   :  { %v1102_v1 = vpop.trf.xlu0 }
  0xba   :  { %v1104_v41 = vpop.trf.xlu0 }
  0xbe   :  { %v1106_v42 = vpop.trf.xlu0 }
  0xc2   :  { %v1108_v43 = vpop.trf.xlu0 }
  0xc6   :  { %v1110_v27 = vpop.trf.xlu0 }
  0xca   :  { %v1112_v44 = vpop.trf.xlu0 }
  0xce   :  { %v1114_v45 = vpop.trf.xlu0 }
  0xd2   :  { %v1116_v46 = vpop.trf.xlu0 }
  0xd6   :  { %v1118_v47 = vpop.trf.xlu0 }
  0xda   :  { %v1120_v48 = vpop.trf.xlu0 }
  0xde   :  { %v1122_v49 = vpop.trf.xlu0 }
  0xe2   :  { %v1124_v50 = vpop.trf.xlu0 }
  0xe6   :  { %v1126_v51 = vpop.trf.xlu0 }
  0xea   :  { %v1128_v52 = vpop.trf.xlu0 }
  0xee   :  { %v1130_v53 = vpop.trf.xlu0 }
  0xef LB: > { %v374_v54 = vstv %s996_s0  ;;  %vm392_vm1 = vcmask 195584   ;;  %v1003_v23 = vmov 0.0   ;;  %vm1004_vm3 = vmmov 0   ;;  %s368_s1 = scalar_lea.vmem [#allocation7], %s996_s0  ;;  %s366_s21 = scalar_lea.vmem [#allocation4], %s996_s0  ;;  %s996_s0 = sphi %s1134_s0, %s364_s0   ;;  %v992_v39 = vphi %v318_v39, %v1333_v39  }
  0xf0   : > { %vm1144_vm2 = vcmp.eq.s32.totalorder %v1030_v3, %v374_v54  ;;  %828 = vmatprep.subr.bf16.mxu0 %v1003_v23  ;;  %844 = vmatprep.mubr.msk.bf16.mxu0 %vm1004_vm3, %v1003_v23  ;;  %v1215_v29 = vld [vmem:[%s368_s1] sm:$0x1]  ;;  %vm655_vm4 = vcmask 1040384   ;;  %v459_v35 = vsub.s32 0, %v1028_v2  ;;  %p692_p10 = scmp.lt.s32.totalorder %s996_s0, 20  ;;  %s364_s0 = sadd.s32 1, %s996_s0  }
  0xf1   : > { %v390_v56 = vsel %vm1144_vm2, %v1128_v52, 0.0  ;;  %v388_v58 = vsel %vm1144_vm2, %v1124_v50, 0.0  ;;  %v391_v59 = vsel %vm1144_vm2, %v1130_v53, 0.0  ;;  %v389_v0 = vsel %vm1144_vm2, %v1126_v51, 0.0  ;;  %v367_v33 = vld [vmem:[%s366_s21] sm:$0x1] }
  0xf2   : > { %v435_v62 = vsel %vm392_vm1, %v390_v56, 0.0  ;;  %v429_v63 = vsel %vm392_vm1, %v388_v58, 0.0  ;;  %v438_v4 = vsel %vm392_vm1, %v391_v59, 0.0  ;;  %v432_v5 = vsel %vm392_vm1, %v389_v0, 0.0  ;;  %v455_v56 = vld [vmem:[#allocation2 + $0x38] sm:$0xf] }
  0xf3   : > { %436 = vadd.xlane.f32.xlu0 %v435_v62  ;;  %430 = vadd.xlane.f32.xlu1 %v429_v63  ;;  %v387_v7 = vsel %vm1144_vm2, %v1122_v49, 0.0  ;;  %v386_v8 = vsel %vm1144_vm2, %v1120_v48, 0.0  ;;  %v385_v11 = vsel %vm1144_vm2, %v1118_v47, 0.0  ;;  %v384_v12 = vsel %vm1144_vm2, %v1116_v46, 0.0  ;;  %v456_v62 = vld [vmem:[#allocation2 + $0x3c] sm:$0xf] }
  0xf4   : > { %v426_v9 = vsel %vm392_vm1, %v387_v7, 0.0  ;;  %v423_v10 = vsel %vm392_vm1, %v386_v8, 0.0  ;;  %v420_v13 = vsel %vm392_vm1, %v385_v11, 0.0  ;;  %v417_v14 = vsel %vm392_vm1, %v384_v12, 0.0  ;;  %v454_v8 = vld [vmem:[#allocation2 + $0x34] sm:$0xf] }
  0xf5   : > { %v383_v15 = vsel %vm1144_vm2, %v1114_v45, 0.0  ;;  %v382_v16 = vsel %vm1144_vm2, %v1112_v44, 0.0  ;;  %v381_v17 = vsel %vm1144_vm2, %v1110_v27, 0.0  ;;  %v380_v18 = vsel %vm1144_vm2, %v1108_v43, 0.0  ;;  %v452_v12 = vld [vmem:[#allocation2 + $0x2c] sm:$0xf] }
  0xf6   : > { %v414_v57 = vsel %vm392_vm1, %v383_v15, 0.0  ;;  %v411_v60 = vsel %vm392_vm1, %v382_v16, 0.0  ;;  %v408_v6 = vsel %vm392_vm1, %v381_v17, 0.0  ;;  %v405_v19 = vsel %vm392_vm1, %v380_v18, 0.0  ;;  %v446_v59 = vld [vmem:[#allocation2 + $0x14] sm:$0xf] }
  0xf7   : > { %439 = vadd.xlane.f32.xlu0 %v438_v4  ;;  %433 = vadd.xlane.f32.xlu1 %v432_v5  ;;  %v379_v20 = vsel %vm1144_vm2, %v1106_v42, 0.0  ;;  %v378_v61 = vsel %vm1144_vm2, %v1104_v41, 0.0  ;;  %v377_v24 = vsel %vm1144_vm2, %v1102_v1, 0.0  ;;  %v376_v25 = vsel %vm1144_vm2, %v1100_v40, 0.0  ;;  %v453_v4 = vld [vmem:[#allocation2 + $0x30] sm:$0xf] }
  0xf8   : > { %v402_v21 = vsel %vm392_vm1, %v379_v20, 0.0  ;;  %v399_v22 = vsel %vm392_vm1, %v378_v61, 0.0  ;;  %v396_v26 = vsel %vm392_vm1, %v377_v24, 0.0  ;;  %v393_v28 = vsel %vm392_vm1, %v376_v25, 0.0  ;;  %v450_v20 = vld [vmem:[#allocation2 + $0x24] sm:$0xf] }
  0xf9   : > { %v656_v30 = vsel %vm655_vm4, %v1215_v29, 0.0  ;;  %v370_v31 = vmul.f32 2.0, %v1215_v29  ;;  %s693_s22 = scalar_select %p692_p10, 0.05, 0.0 }
  0xfa   : > { %p361_p11 = scmp.ge.s32.totalorder %s364_s0, 24  }
  0xfb   : > { %427 = vadd.xlane.f32.xlu1 %v426_v9  ;;  %424 = vadd.xlane.f32.xlu0 %v423_v10  ;;  %v762_v32 = vadd.f32 -1.0, %v370_v31  ;;  %v448_v31 = vld [vmem:[#allocation2 + $0x1c] sm:$0xf]  ;;  %s694_s23 = smul.f32 1.2, %s693_s22  ;;  %s1005_s24 = smov (%p361_p11), [#allocation9]  }
  0xfc   :  { %s723_s25 = sshll.u32 (%p361_p11), %s1005_s24, 4  ;;  %s724_s25 = int_to_ptr.vmem [resolvable:$true] %s723_s25 }
  0xfd   : > { %v372_v34 = vmul.f32 %v762_v32, %v367_v33  ;;  %s956_s27 = scalar_lea.vmem (%p361_p11), %s724_s25, 16  ;;  %s960_s28 = scalar_lea.vmem (%p361_p11), %s724_s25, 32 }
  0xfe   :  { %p957_p12 = scmp.ne.s32.totalorder (%p361_p11), %s724_s25, %s956_s27  ;;  %p961_p13 = scmp.lt.s32.totalorder (%p361_p11), %s724_s25, %s724_s25 }
  0xff   : > { %421 = vadd.xlane.f32.xlu1 %v420_v13  ;;  %418 = vadd.xlane.f32.xlu0 %v417_v14  ;;  %v1222_v36 = vsub.f32 1.0, %v372_v34  ;;  %p962_p0 = scmp.lt.s32.totalorder (%p361_p11), %s960_s28, %s956_s27 }
 0x101   : > { %v1227_v37 = vrot.slane %v1222_v36, %v459_v35  ;;  %p963_p1 = por (%p361_p11), %p962_p0, %p961_p13 }
 0x103   : > { %415 = vadd.xlane.f32.xlu1 %v414_v57  ;;  %412 = vadd.xlane.f32.xlu0 %v411_v60  ;;  %v451_v60 = vld [vmem:[#allocation2 + $0x28] sm:$0xf]  ;;  %p964_p2 = pnand (%p361_p11), %p963_p1, %p957_p12 }
 0x107   : > { %409 = vadd.xlane.f32.xlu1 %v408_v6  ;;  %406 = vadd.xlane.f32.xlu0 %v405_v19 }
 0x10b   : > { %403 = vadd.xlane.f32.xlu1 %v402_v21  ;;  %400 = vadd.xlane.f32.xlu0 %v399_v22 }
 0x10f   : > { %397 = vadd.xlane.f32.xlu1 %v396_v26  ;;  %394 = vadd.xlane.f32.xlu0 %v393_v28  ;;  %v449_v26 = vld [vmem:[#allocation2 + $0x20] sm:$0xf] }
 0x113   : > { %657 = vadd.xlane.f32.xlu0 %v656_v30 }
 0x17c   : > { %v437_v38 = vpop.xlane.xlu0 %436  ;;  %v431_v54 = vpop.xlane.xlu1 %430 }
 0x17d   : > { %vm475_vm5 = vcmp.gt.f32.partialorder %v437_v38, %v1227_v37  ;;  %vm491_vm6 = vcmp.eq.f32.partialorder %v437_v38, %v1227_v37  ;;  %vm489_vm7 = vcmp.eq.f32.partialorder %v431_v54, %v1227_v37  ;;  %vm473_vm9 = vcmp.gt.f32.partialorder %v431_v54, %v1227_v37 }
 0x17e   : > { %vm1232_vm8 = vmpackc.low %vm491_vm6, %vm491_vm6 }
 0x17f   : > { %vm1237_vm10 = vmpackc.low %vm475_vm5, %vm475_vm5  ;;  %v523_v7 = vsel %vm1232_vm8, %v455_v56, 0  ;;  %v447_v56 = vld [vmem:[#allocation2 + $0x18] sm:$0xf] }
 0x180   : > { %vm1241_vm11 = vmpackc.low %vm489_vm7, %vm489_vm7  ;;  %v440_v63 = vpop.xlane.xlu0 %439  ;;  %v434_v0 = vpop.xlane.xlu1 %433  ;;  %v555_v57 = vsel %vm1237_vm10, 1065369472, %v523_v7 }
 0x181   : > { %vm1245_vm12 = vmpackc.low %vm473_vm9, %vm473_vm9  ;;  %vm476_vm13 = vcmp.gt.f32.partialorder %v440_v63, %v1227_v37  ;;  %vm492_vm14 = vcmp.eq.f32.partialorder %v440_v63, %v1227_v37  ;;  %vm474_vm0 = vcmp.gt.f32.partialorder %v434_v0, %v1227_v37  ;;  %vm490_vm1 = vcmp.eq.f32.partialorder %v434_v0, %v1227_v37 }
 0x182   : > { %vm508_vm15 = vmpackc.low %vm492_vm14, %vm492_vm14  ;;  %v521_v10 = vsel %vm1241_vm11, %v453_v4, 0 }
 0x183   : > { %v524_v9 = vsel %vm508_vm15, %v456_v62, 0  ;;  %vm540_vm2 = vmpackc.low %vm476_vm13, %vm476_vm13  ;;  %v553_v18 = vsel %vm1245_vm12, 1065369472, %v521_v10  ;;  %v444_v10 = vld [vmem:[#allocation2 + $0xc] sm:$0xf] }
 0x184   : > { %vm1257_vm3 = vmpackc.low %vm490_vm1, %vm490_vm1  ;;  %v428_v13 = vpop.xlane.xlu1 %427  ;;  %v425_v14 = vpop.xlane.xlu0 %424  ;;  %v556_v15 = vsel %vm540_vm2, 1065369472, %v524_v9 }
 0x185   : > { %v522_v16 = vsel %vm1257_vm3, %v454_v8, 0  ;;  %vm538_vm5 = vmpackc.low %vm474_vm0, %vm474_vm0  ;;  %vm472_vm6 = vcmp.gt.f32.partialorder %v428_v13, %v1227_v37  ;;  %vm488_vm7 = vcmp.eq.f32.partialorder %v428_v13, %v1227_v37  ;;  %vm471_vm9 = vcmp.gt.f32.partialorder %v425_v14, %v1227_v37  ;;  %v445_v8 = vld [vmem:[#allocation2 + $0x10] sm:$0xf] }
 0x186   : > { %vm504_vm8 = vmpackc.low %vm488_vm7, %vm488_vm7  ;;  %vm487_vm11 = vcmp.eq.f32.partialorder %v425_v14, %v1227_v37  ;;  %v770_v17 = vcombine.low %v555_v57, %v556_v15  ;;  %v554_v6 = vsel %vm538_vm5, 1065369472, %v522_v16  ;;  %v443_v57 = vld [vmem:[#allocation2 + $0x8] sm:$0xf] }
 0x187   : > { %v520_v19 = vsel %vm504_vm8, %v452_v12, 0  ;;  %vm536_vm13 = vmpackc.low %vm472_vm6, %vm472_vm6  ;;  %v769_v28 = vcombine.low %v553_v18, %v554_v6 }
 0x188   : > { %vm503_vm14 = vmpackc.low %vm487_vm11, %vm487_vm11  ;;  %829 = vmatpush3.bf16.msra.mxu0 %v770_v17  ;;  %v422_v61 = vpop.xlane.xlu1 %421  ;;  %v419_v21 = vpop.xlane.xlu0 %418  ;;  %v552_v22 = vsel %vm536_vm13, 1065369472, %v520_v19  ;;  %v442_v17 = vld [vmem:[#allocation2 + $0x4] sm:$0xf] }
 0x189   : > { %v519_v24 = vsel %vm503_vm14, %v451_v60, 0  ;;  %vm535_vm10 = vmpackc.low %vm471_vm9, %vm471_vm9  ;;  %830 = vmatprep.subr.bf16.mxu0 %v1003_v23  ;;  %vm470_vm15 = vcmp.gt.f32.partialorder %v422_v61, %v1227_v37  ;;  %vm486_vm0 = vcmp.eq.f32.partialorder %v422_v61, %v1227_v37  ;;  %vm469_vm12 = vcmp.gt.f32.partialorder %v419_v21, %v1227_v37 }
 0x18a   : > { %v551_v25 = vsel %vm535_vm10, 1065369472, %v519_v24  ;;  %vm502_vm1 = vmpackc.low %vm486_vm0, %vm486_vm0  ;;  %vm485_vm2 = vcmp.eq.f32.partialorder %v419_v21, %v1227_v37  ;;  %v441_v24 = vld [vmem:[#allocation2] sm:$0xf] }
 0x18b   : > { %v518_v30 = vsel %vm502_vm1, %v450_v20, 0  ;;  %vm534_vm3 = vmpackc.low %vm470_vm15, %vm470_vm15  ;;  %v768_v34 = vcombine.low %v551_v25, %v552_v22  ;;  %v562_v20 = vrot.slane %v1215_v29, %v459_v35 }
 0x18c   : > { %vm501_vm5 = vmpackc.low %vm485_vm2, %vm485_vm2  ;;  %831 = vmatpush3.bf16.msra.mxu0 %v769_v28  ;;  %v416_v32 = vpop.xlane.xlu1 %415  ;;  %v413_v33 = vpop.xlane.xlu0 %412  ;;  %v550_v38 = vsel %vm534_vm3, 1065369472, %v518_v30 }
 0x18d   : > { %v517_v54 = vsel %vm501_vm5, %v449_v26, 0  ;;  %vm533_vm6 = vmpackc.low %vm469_vm12, %vm469_vm12  ;;  %832 = vmatprep.subr.bf16.mxu0 %v1003_v23  ;;  %vm468_vm7 = vcmp.gt.f32.partialorder %v416_v32, %v1227_v37  ;;  %vm484_vm8 = vcmp.eq.f32.partialorder %v416_v32, %v1227_v37  ;;  %vm467_vm11 = vcmp.gt.f32.partialorder %v413_v33, %v1227_v37 }
 0x18e   : > { %v549_v55 = vsel %vm533_vm6, 1065369472, %v517_v54  ;;  %vm500_vm9 = vmpackc.low %vm484_vm8, %vm484_vm8  ;;  %vm483_vm13 = vcmp.eq.f32.partialorder %v413_v33, %v1227_v37 }
 0x18f   : > { %v516_v58 = vsel %vm500_vm9, %v448_v31, 0  ;;  %vm532_vm14 = vmpackc.low %vm468_vm7, %vm468_vm7  ;;  %v767_v0 = vcombine.low %v549_v55, %v550_v38 }
 0x190   : > { %vm499_vm10 = vmpackc.low %vm483_vm13, %vm483_vm13  ;;  %833 = vmatpush3.bf16.msra.mxu0 %v768_v34  ;;  %v410_v62 = vpop.xlane.xlu1 %409  ;;  %v407_v63 = vpop.xlane.xlu0 %406  ;;  %v548_v4 = vsel %vm532_vm14, 1065369472, %v516_v58  ;;  %v670_v34 = vrot.slane %v1215_v29, 7 }
 0x191   : > { %v515_v5 = vsel %vm499_vm10, %v447_v56, 0  ;;  %vm531_vm15 = vmpackc.low %vm467_vm11, %vm467_vm11  ;;  %834 = vmatprep.subr.bf16.mxu0 %v1003_v23  ;;  %vm466_vm0 = vcmp.gt.f32.partialorder %v410_v62, %v1227_v37  ;;  %vm482_vm1 = vcmp.eq.f32.partialorder %v410_v62, %v1227_v37  ;;  %vm465_vm2 = vcmp.gt.f32.partialorder %v407_v63, %v1227_v37 }
 0x192   : > { %v547_v7 = vsel %vm531_vm15, 1065369472, %v515_v5  ;;  %vm498_vm12 = vmpackc.low %vm482_vm1, %vm482_vm1  ;;  %vm481_vm3 = vcmp.eq.f32.partialorder %v407_v63, %v1227_v37 }
 0x193   : > { %v514_v9 = vsel %vm498_vm12, %v446_v59, 0  ;;  %vm530_vm5 = vmpackc.low %vm466_vm0, %vm466_vm0  ;;  %v766_v13 = vcombine.low %v547_v7, %v548_v4 }
 0x194   : > { %vm497_vm6 = vmpackc.low %vm481_vm3, %vm481_vm3  ;;  %835 = vmatpush3.bf16.msra.mxu0 %v767_v0  ;;  %v404_v11 = vpop.xlane.xlu1 %403  ;;  %v401_v12 = vpop.xlane.xlu0 %400  ;;  %v546_v14 = vsel %vm530_vm5, 1065369472, %v514_v9 }
 0x195   : > { %v513_v15 = vsel %vm497_vm6, %v445_v8, 0  ;;  %vm529_vm7 = vmpackc.low %vm465_vm2, %vm465_vm2  ;;  %836 = vmatprep.subr.bf16.mxu0 %v1003_v23  ;;  %vm464_vm8 = vcmp.gt.f32.partialorder %v404_v11, %v1227_v37  ;;  %vm480_vm9 = vcmp.eq.f32.partialorder %v404_v11, %v1227_v37  ;;  %vm463_vm13 = vcmp.gt.f32.partialorder %v401_v12, %v1227_v37 }
 0x196   : > { %v545_v16 = vsel %vm529_vm7, 1065369472, %v513_v15  ;;  %vm496_vm11 = vmpackc.low %vm480_vm9, %vm480_vm9  ;;  %vm479_vm14 = vcmp.eq.f32.partialorder %v401_v12, %v1227_v37  ;;  %vm558_vm6 = vcmp.eq.s32.totalorder %v1028_v2, 1 }
 0x197   : > { %v512_v60 = vsel %vm496_vm11, %v444_v10, 0  ;;  %vm528_vm10 = vmpackc.low %vm464_vm8, %vm464_vm8  ;;  %v765_v19 = vcombine.low %v545_v16, %v546_v14  ;;  %vm557_vm11 = vcmp.eq.s32.totalorder %v1028_v2, 0  ;;  %v563_v30 = vsel %vm558_vm6, %v562_v20, 0.0 }
 0x198   : > { %vm495_vm15 = vmpackc.low %vm479_vm14, %vm479_vm14  ;;  %837 = vmatpush3.bf16.msra.mxu0 %v766_v13  ;;  %v398_v18 = vpop.xlane.xlu1 %397  ;;  %v395_v6 = vpop.xlane.xlu0 %394  ;;  %v544_v61 = vsel %vm528_vm10, 1065369472, %v512_v60  ;;  %v564_v33 = vsel %vm557_vm11, 1.0, %v563_v30  ;;  %v688_v10 = vmul.f32 1.442695, %v1222_v36  ;;  %v687_v16 = vadd.f32 1.0, %v1222_v36 }
 0x199   : > { %v511_v21 = vsel %vm495_vm15, %v443_v57, 0  ;;  %vm527_vm0 = vmpackc.low %vm463_vm13, %vm463_vm13  ;;  %838 = vmatprep.subr.bf16.mxu0 %v1003_v23  ;;  %vm462_vm1 = vcmp.gt.f32.partialorder %v398_v18, %v1227_v37  ;;  %vm478_vm12 = vcmp.eq.f32.partialorder %v398_v18, %v1227_v37  ;;  %vm461_vm3 = vcmp.gt.f32.partialorder %v395_v6, %v1227_v37 }
 0x19a   : > { %v543_v22 = vsel %vm527_vm0, 1065369472, %v511_v21  ;;  %vm494_vm2 = vmpackc.low %vm478_vm12, %vm478_vm12  ;;  %vm477_vm5 = vcmp.eq.f32.partialorder %v395_v6, %v1227_v37  ;;  %v565_v37 = vpack.c.bf16 %v564_v33, %v564_v33  ;;  %vm686_vm13 = vcmp.gt.f32.partialorder %v1222_v36, 0.0 }
 0x19b   : > { %v510_v25 = vsel %vm494_vm2, %v442_v17, 0  ;;  %vm526_vm7 = vmpackc.low %vm462_vm1, %vm462_vm1  ;;  %v764_v35 = vcombine.low %v543_v22, %v544_v61 }
 0x19c   : > { %vm493_vm8 = vmpackc.low %vm477_vm5, %vm477_vm5  ;;  %839 = vmatpush3.bf16.msra.mxu0 %v765_v19  ;;  %v542_v26 = vsel %vm526_vm7, 1065369472, %v510_v25  ;;  %v658_v56 = vpop.xlane.xlu0 %657  ;;  %v696_v19 = vstv %s694_s23 }
 0x19d   : > { %v509_v28 = vsel %vm493_vm8, %v441_v24, 0  ;;  %vm525_vm9 = vmpackc.low %vm461_vm3, %vm461_vm3  ;;  %840 = vmatprep.subr.bf16.mxu0 %v1003_v23 }
 0x19e   : > { %v541_v31 = vsel %vm525_vm9, 1065369472, %v509_v28 }
 0x19f   : > { %v763_v32 = vcombine.low %v541_v31, %v542_v26 }
 0x1a0   : > { %841 = vmatpush3.bf16.msra.mxu0 %v764_v35 }
 0x1a1   : > { %842 = vmatprep.subr.bf16.mxu0 %v1003_v23 }
 0x1a4   : > { %843 = vmatpush3.bf16.msra.mxu0 %v763_v32 }
 0x1a7   : > { %845 = vmatmul.mubr.bf16.vlgmr.msra.gmra.mxu0 %v565_v37 }
 0x267   : > { %v648_v38 = vpop.f32.mrf.mxu0 }
 0x268   : > { %v771_v54 = vadd.f32 -1.0, %v648_v38  ;;  %v672_v55 = vsub.f32 %v648_v38, %v670_v34  ;;  %v660_v4 = vrot.slane %v648_v38, 1 }
 0x269   : > { %v846_v58 = vpop.f32.mrf.mxu0 }
 0x26a   : > { %v674_v59 = vrot.slane %v672_v55, 1  ;;  %v663_v62 = vadd.f32 1.0, %v771_v54  ;;  %v677_v63 = vadd.f32 %v771_v54, %v658_v56  ;;  %v662_v29 = vsub.f32 %v658_v56, %v660_v4 }
 0x26b   : > { %v651_v0 = vpop.f32.mrf.mxu0  ;;  %vm683_vm14 = vcmp.lt.f32.partialorder %v771_v54, 0.5 }
 0x26c   : > { %v664_v5 = vadd.f32 %v663_v62, %v658_v56  ;;  %v678_v7 = vsub.f32 %v677_v63, %v674_v59  ;;  %v676_v12 = vsub.f32 %v658_v56, %v674_v59 }
 0x26d   : > { %v847_v8 = vpop.f32.mrf.mxu0 }
 0x26e   : > { %v665_v23 = vsub.f32 %v664_v5, %v660_v4  ;;  %v679_v9 = vmax.f32 %v678_v7, 1.0 }
 0x270   : > { %910 = vrcp.f32 %v665_v23 }
 0x271   : > { %912 = vrcp.f32 %v679_v9 }
 0x272   : > { %914 = vpow2.f32 %v688_v10 }
 0x27d   : > { %v911_v11 = vpop.eup %910 }
 0x27e   : > { %v913_v13 = vpop.eup %912  ;;  %v667_v14 = vmul.f32 %v911_v11, %v662_v29 }
 0x27f   : > { %v681_v15 = vmul.f32 %v913_v13, %v676_v12  ;;  %v915_v57 = vpop.eup %914 }
 0x280   : > { %v668_v60 = vsub.f32 1.0, %v667_v14  ;;  %v690_v6 = vsel %vm686_vm13, %v687_v16, %v915_v57 }
 0x281   : > { %v682_v17 = vsub.f32 1.0, %v681_v15 }
 0x283   : > { %v684_v18 = vsub.f32 %v668_v60, %v682_v17 }
 0x285   : > { %v685_v20 = vsel %vm683_vm14, %v668_v60, %v684_v18 }
 0x286   : > { %v695_v61 = vmul.f32 %v690_v6, %v685_v20 }
 0x288   : > { %v697_v21 = vmul.f32 %v696_v19, %v695_v61  ;;  %363 = sbr.rel (!%p361_p11) target bundleno = 239 (0xef), region = 55 }
 0x28a   : > { %v698_v22 = vadd.f32 %v992_v39, %v697_v21  }
 0x28c   : > { %v1333_v39 = vmov %v698_v22  ;;  %699 = vst [vmem:[#allocation3] sm:$0x1] (%p361_p11), %v698_v22 }
 0x293   :  { %v703_v36 = vld [vmem:[#allocation3] sm:$0x1] }
 0x294   :  { %v705_v24 = vsel %vm655_vm4, %v703_v36, 0.0 }
 0x295   :  { %706 = vadd.xlane.f32.xlu0 %v705_v24 }
 0x31e   :  { %v707_v25 = vpop.xlane.xlu0 %706 }
 0x31f   :  { %v708_v35 = vrot.slane %v707_v25, 4 }
 0x321   :  { %v709_v26 = vadd.f32 %v708_v35, %v707_v25 }
 0x323   :  { %v710_v28 = vrot.slane %v709_v26, 2 }
 0x325   :  { %v711_v30 = vadd.f32 %v710_v28, %v709_v26 }
 0x327   :  { %v712_v31 = vrot.slane %v711_v30, 1 }
 0x329   :  { %v713_v39 = vadd.f32 %v712_v31, %v711_v30 }
 0x32b   :  { %848 = vpush %v713_v39 }
 0x35c   :  { %s849_s26 = spop %848 }
 0x35d   :  { %v715_v32 = vstv %s849_s26 }
 0x35e   :  { %716 = vst [vmem:[#allocation9] sm:$0x1] %v715_v32 }
 0x35f   :  { %967 = shalt.err (!%p964_p2)
}
 0x360   :  { %726 = dma.vmem_to_hbm [thread:$0]  %s724_s25, 16, %s1320_s2, [#allocation6]  }
 0x361   :  { %988 = dma.done.wait [#allocation6], 16  }
 0x362   :  { %989 = vsyncadd [#allocation6], 4294967280 }
 0x363   :  { %730 = vsyncpa [#allocation5], 1 }
 0x364   :  { %731 = vsyncpa [#allocation8], 1 }
 0x365   :  { %732 = vsyncpa [#allocation6], 1 }

</bundles_post_ra>
